<compile_context>
chip_gen: v7x
topology: tpu7x:2x2x1
jax: 0.10.0
libtpu: 0.0.40
codegen_flags: <defaults>
</compile_context>

<pallas_src>
import functools

import jax
import jax.numpy as jnp
from jax.experimental import pallas as pl
from jax.experimental.pallas import tpu as pltpu


_LANES = 128
_ROW_ALIGN = 32     # lcm of f32/bf16 sublane tiles (8/16) and int8 label tiles (32)


def _cdiv(a, b):
    return -(-a // b)


def _round_up(a, m):
    return _cdiv(a, m) * m


def _dice_kernel(x_ref, t_ref, inter_ref, union_ref, *,
                 n_classes: int, tile_rows: int, needs_mask: bool):
    s = pl.program_id(2)

    # First spatial step for this (batch, core-half): zero the resident
    # (1, C, 8, 128) output accumulators.
    @pl.when(s == 0)
    def _():
        inter_ref[...] = jnp.zeros_like(inter_ref)
        union_ref[...] = jnp.zeros_like(union_ref)

    C = n_classes
    x = x_ref[0]                               # (C, tile_rows, 128), input dtype
    t = t_ref[0].astype(jnp.int32)             # (tile_rows, 128) labels
    xs = [x[c].astype(jnp.float32) for c in range(C)]

    if C == 2:
        # Binary fast path: softmax over 2 classes == sigmoid of the logit
        # difference (one exp per pixel, no class-axis max/sum).
        z = xs[1] - xs[0]
        p1 = pl.reciprocal(1.0 + jnp.exp(-z), approx=True)
        ps = [1.0 - p1, p1]
    else:
        # Max-stabilized softmax across the leading class axis: pure
        # elementwise VPU/EUP work over dense (tile_rows, 128) slabs.
        m = xs[0]
        for c in range(1, C):
            m = jnp.maximum(m, xs[c])
        es = [jnp.exp(xc - m) for xc in xs]
        tot = es[0]
        for c in range(1, C):
            tot = tot + es[c]
        inv = pl.reciprocal(tot, approx=True)
        ps = [e * inv for e in es]

    # Padded pixels carry label == C, so `t < C` is the validity mask.  This
    # select only exists (compile-time) when the shape actually needed padding.
    valid = (t < C) if needs_mask else None

    n_sub = tile_rows // 8
    inter_parts = []
    union_parts = []
    for c in range(C):
        p_c = ps[c]
        if needs_mask:
            p_c = jnp.where(valid, p_c, 0.0)
        onehot_c = (t == c)
        ic = jnp.where(onehot_c, p_c, 0.0)            # p * onehot
        uc = jnp.where(onehot_c, p_c + 1.0, p_c)      # p + onehot
        # Tree-reduce (tile_rows, 128) -> (8, 128): plain vreg adds, no XLU.
        inter_parts.append(jnp.sum(ic.reshape(n_sub, 8, _LANES), axis=0))
        union_parts.append(jnp.sum(uc.reshape(n_sub, 8, _LANES), axis=0))

    inter_ref[...] += jnp.stack(inter_parts, axis=0)[None]
    union_ref[...] += jnp.stack(union_parts, axis=0)[None]


def _choose_tiling(n_rows, n_classes, x_itemsize, *, max_rows, vmem_budget):
    """Pick the spatial tile (in 128-lane rows), step count and core-split.

    VMEM model per 128-lane row (bytes):
      * logits + label input blocks, double-buffered : 2*(C*itemsize + 4)*128
      * f32 softmax / contribution temporaries       : ~(2C + 4)*4*128
    """
    per_row = _LANES * (2 * (n_classes * x_itemsize + 4) + (2 * n_classes + 4) * 4)
    cap = min(max_rows, max(_ROW_ALIGN, vmem_budget // per_row))
    cap -= cap % _ROW_ALIGN
    cap = max(cap, _ROW_ALIGN)
    # Split the spatial axis in two whenever there is enough work, so both
    # TensorCores of a v7x chip stay busy even at batch == 1 (harmless on
    # single-TC v5e / v6e: same total number of grid steps).
    num_splits = 2 if n_rows >= 2 * _ROW_ALIGN else 1
    n_steps = max(_cdiv(n_rows, cap), num_splits)
    n_steps = _round_up(n_steps, num_splits)
    tile_rows = _round_up(_cdiv(n_rows, n_steps), _ROW_ALIGN)
    return tile_rows, n_steps, num_splits


def soft_dice_loss(logits, target, *, n_classes: int = 2, smooth: float = 0.1,
                   max_tile_rows=None, vmem_budget: int = 20 << 20):
    """Pallas implementation of SoftDiceLoss.forward.

    logits: (B, C, H, W) float (f32 or bf16), C == n_classes
    target: (B, 1, H, W) integer class labels in [0, n_classes)
    returns: scalar float32 loss
    """
    B, C, H, W = logits.shape
    assert C == n_classes and n_classes >= 2
    S = H * W
    R = _cdiv(S, _LANES)                      # spatial size in 128-lane rows

    max_rows = 8192 if max_tile_rows is None else max(
        _ROW_ALIGN, max_tile_rows - max_tile_rows % _ROW_ALIGN)
    tile_rows, n_steps, num_splits = _choose_tiling(
        R, C, logits.dtype.itemsize, max_rows=max_rows, vmem_budget=vmem_budget)
    n_sh = n_steps // num_splits
    R_pad = n_steps * tile_rows
    pad_px = R_pad * _LANES - S
    needs_mask = pad_px > 0

    x = logits.reshape(B, C, S)               # keep input dtype (no upcast)
    t = target.reshape(B, S)
    # Labels travel as int8 when (a) they already are 1 byte or (b) a padding
    # pass over them exists anyway; otherwise keep int32 to avoid creating an
    # extra HBM pass just to downcast.
    if t.dtype.itemsize == 1 or needs_mask:
        t = t.astype(jnp.int8)
    else:
        t = t.astype(jnp.int32)
    if needs_mask:
        # Pad the spatial tail: zero logits (neutralized by the in-kernel
        # select) and out-of-range class C labels (one-hot and valid mask = 0).
        x = jnp.pad(x, ((0, 0), (0, 0), (0, pad_px)))
        t = jnp.pad(t, ((0, 0), (0, pad_px)), constant_values=n_classes)
    x = x.reshape(B, C, R_pad, _LANES)
    t = t.reshape(B, R_pad, _LANES)

    kernel = functools.partial(_dice_kernel, n_classes=C, tile_rows=tile_rows,
                               needs_mask=needs_mask)

    out_rows = B * num_splits
    inter, union = pl.pallas_call(
        kernel,
        out_shape=(jax.ShapeDtypeStruct((out_rows, C, 8, _LANES), jnp.float32),
                   jax.ShapeDtypeStruct((out_rows, C, 8, _LANES), jnp.float32)),
        grid_spec=pltpu.PrefetchScalarGridSpec(
            num_scalar_prefetch=0,
            grid=(B, num_splits, n_sh),
            in_specs=[
                pl.BlockSpec((1, C, tile_rows, _LANES),
                             lambda b, h, s: (b, 0, h * n_sh + s, 0)),
                pl.BlockSpec((1, tile_rows, _LANES),
                             lambda b, h, s: (b, h * n_sh + s, 0)),
            ],
            out_specs=[
                pl.BlockSpec((1, C, 8, _LANES),
                             lambda b, h, s: (b * num_splits + h, 0, 0, 0)),
                pl.BlockSpec((1, C, 8, _LANES),
                             lambda b, h, s: (b * num_splits + h, 0, 0, 0)),
            ],
        ),
        compiler_params=pltpu.CompilerParams(
            # Batch and core-split axes carry no state -> parallel (megacore /
            # v7x 2-TC sharding); the spatial axis carries the accumulator.
            dimension_semantics=("parallel", "parallel", "arbitrary"),
            # Explicit limit: above v5e's 16 MiB scoped default, below v7x's
            # 64 MiB physical VMEM, leaving compiler headroom.
            vmem_limit_bytes=48 << 20),
    )(x, t)

    # Final tiny reduction + dice arithmetic in the wrapper.
    inter = inter.reshape(B, num_splits, C, 8 * _LANES).sum(axis=(1, 3)) + smooth
    union = union.reshape(B, num_splits, C, 8 * _LANES).sum(axis=(1, 3)) + smooth
    score = jnp.sum(2.0 * inter / union)
    return (1.0 - score / float(B * C)).astype(jnp.float32)


def _reference_soft_dice_loss(logits, target, n_classes):
    # Pure-JAX reference mirroring the PyTorch forward exactly.
    smooth = 0.1
    B = logits.shape[0]
    p = jax.nn.softmax(logits.astype(jnp.float32), axis=1).reshape(B, n_classes, -1)
    labels = target.reshape(B, -1)
    t1h = jnp.transpose(jax.nn.one_hot(labels, n_classes, dtype=jnp.float32),
                        (0, 2, 1))                                  # (B, C, S)
    inter = jnp.sum(p * t1h, axis=2) + smooth
    union = jnp.sum(p, axis=2) + jnp.sum(t1h, axis=2) + smooth
    score = jnp.sum(2.0 * inter / union)
    return 1.0 - score / float(B * n_classes)


if __name__ == "__main__":
    key = jax.random.PRNGKey(0)
    k1, k2, k3, k4, k5, k6 = jax.random.split(key, 6)

    # Tolerance accounts for the EUP approximate-reciprocal path
    # (pl.reciprocal(approx=True)) in the softmax / sigmoid denominator.
    TOL = dict(rtol=2e-3, atol=2e-3)

    # Config 1: module defaults (n_classes=2) -> sigmoid fast path, f32 logits,
    # spatial tail padding + int8 label path.
    B, C, H, W = 2, 2, 16, 16
    logits = jax.random.normal(k1, (B, C, H, W), dtype=jnp.float32)
    target = jax.random.randint(k2, (B, 1, H, W), 0, C, dtype=jnp.int32)
    loss = jax.block_until_ready(soft_dice_loss(logits, target, n_classes=C))
    ref = _reference_soft_dice_loss(logits, target, C)
    assert jnp.allclose(loss, ref, **TOL), (loss, ref)

    # Config 2: general softmax path, bf16 logits, H*W not a multiple of 128
    # (exercises the padded-target / valid-select path).
    B2, C2, H2, W2 = 2, 4, 12, 11
    logits2 = jax.random.normal(k3, (B2, C2, H2, W2), dtype=jnp.bfloat16)
    target2 = jax.random.randint(k4, (B2, 1, H2, W2), 0, C2, dtype=jnp.int32)
    loss2 = jax.block_until_ready(soft_dice_loss(logits2, target2, n_classes=C2))
    ref2 = _reference_soft_dice_loss(logits2, target2, C2)
    assert jnp.allclose(loss2, ref2, **TOL), (loss2, ref2)

    # Config 3: B == 1 with a forced small tile -> multiple spatial steps per
    # core-half, exercises the core-split axis, the no-pad / no-mask path and
    # int32 labels.
    B3, C3, H3, W3 = 1, 2, 128, 128
    logits3 = jax.random.normal(k5, (B3, C3, H3, W3), dtype=jnp.float32)
    target3 = jax.random.randint(k6, (B3, 1, H3, W3), 0, C3, dtype=jnp.int32)
    loss3 = jax.block_until_ready(
        soft_dice_loss(logits3, target3, n_classes=C3, max_tile_rows=32))
    ref3 = _reference_soft_dice_loss(logits3, target3, C3)
    assert jnp.allclose(loss3, ref3, **TOL), (loss3, ref3)

    print("KERNEL_OK")
</pallas_src>

<mosaic_0001>
module attributes {stable_mosaic.version = 11 : i64} {
  func.func @_dice_kernel(%arg0: i32, %arg1: i32, %arg2: i32, %arg3: memref<1x2x32x128xf32, #tpu.memory_space<vmem>>, %arg4: memref<1x32x128xi8, #tpu.memory_space<vmem>>, %arg5: memref<1x2x8x128xf32, #tpu.memory_space<vmem>>, %arg6: memref<1x2x8x128xf32, #tpu.memory_space<vmem>>) attributes {dimension_semantics = [#tpu.dimension_semantics<parallel>, #tpu.dimension_semantics<parallel>, #tpu.dimension_semantics<arbitrary>], iteration_bounds = array<i64: 2, 1, 1>, scalar_prefetch = 0 : i64, scratch_operands = 0 : i64, tpu.core_type = #tpu.core_type<tc>, window_params = [{transform_indices = @transform_0, window_bounds = array<i64: 1, 2, 32, 128>}, {transform_indices = @transform_1, window_bounds = array<i64: 1, 32, 128>}, {transform_indices = @transform_2, window_bounds = array<i64: 1, 2, 8, 128>}, {transform_indices = @transform_3, window_bounds = array<i64: 1, 2, 8, 128>}]} {
    %c0_i32 = arith.constant 0 : i32
    %0 = arith.cmpi eq, %arg2, %c0_i32 : i32
    %1 = arith.extui %0 : i1 to i32
    %c0_i32_0 = arith.constant 0 : i32
    %2 = arith.cmpi ne, %1, %c0_i32_0 : i32
    scf.if %2 {
      %cst_36 = arith.constant 0.000000e+00 : f32
      %63 = vector.broadcast %cst_36 : f32 to vector<1x2x8x128xf32>
      %c0_37 = arith.constant 0 : index
      %c0_38 = arith.constant 0 : index
      %c0_39 = arith.constant 0 : index
      %c0_40 = arith.constant 0 : index
      %64 = vector.load %arg5[%c0_37, %c0_38, %c0_39, %c0_40] : memref<1x2x8x128xf32, #tpu.memory_space<vmem>>, vector<1x2x8x128xf32>
      tpu.vector_store %arg5[%c0_37, %c0_38, %c0_39, %c0_40], %63 {strides = array<i32>} : memref<1x2x8x128xf32, #tpu.memory_space<vmem>>, vector<1x2x8x128xf32>,
      %cst_41 = arith.constant 0.000000e+00 : f32
      %65 = vector.broadcast %cst_41 : f32 to vector<1x2x8x128xf32>
      %c0_42 = arith.constant 0 : index
      %c0_43 = arith.constant 0 : index
      %c0_44 = arith.constant 0 : index
      %c0_45 = arith.constant 0 : index
      %66 = vector.load %arg6[%c0_42, %c0_43, %c0_44, %c0_45] : memref<1x2x8x128xf32, #tpu.memory_space<vmem>>, vector<1x2x8x128xf32>
      tpu.vector_store %arg6[%c0_42, %c0_43, %c0_44, %c0_45], %65 {strides = array<i32>} : memref<1x2x8x128xf32, #tpu.memory_space<vmem>>, vector<1x2x8x128xf32>,
    } else {
    }
    %c0 = arith.constant 0 : index
    %c0_1 = arith.constant 0 : index
    %c0_2 = arith.constant 0 : index
    %c0_3 = arith.constant 0 : index
    %3 = vector.load %arg3[%c0, %c0_1, %c0_2, %c0_3] : memref<1x2x32x128xf32, #tpu.memory_space<vmem>>, vector<1x2x32x128xf32>
    %4 = vector.shape_cast %3 : vector<1x2x32x128xf32> to vector<2x32x128xf32>
    %c0_4 = arith.constant 0 : index
    %c0_5 = arith.constant 0 : index
    %c0_6 = arith.constant 0 : index
    %5 = vector.load %arg4[%c0_4, %c0_5, %c0_6] : memref<1x32x128xi8, #tpu.memory_space<vmem>>, vector<1x32x128xi8>
    %6 = vector.shape_cast %5 : vector<1x32x128xi8> to vector<32x128xi8>
    %7 = arith.extsi %6 : vector<32x128xi8> to vector<32x128xi32>
    %8 = vector.extract_strided_slice %4 {offsets = [0, 0, 0], sizes = [1, 32, 128], strides = [1, 1, 1]} : vector<2x32x128xf32> to vector<1x32x128xf32>
    %9 = vector.shape_cast %8 : vector<1x32x128xf32> to vector<32x128xf32>
    %10 = vector.extract_strided_slice %4 {offsets = [1, 0, 0], sizes = [1, 32, 128], strides = [1, 1, 1]} : vector<2x32x128xf32> to vector<1x32x128xf32>
    %11 = vector.shape_cast %10 : vector<1x32x128xf32> to vector<32x128xf32>
    %12 = arith.subf %11, %9 : vector<32x128xf32>
    %cst = arith.constant 0.000000e+00 : f32
    %13 = vector.broadcast %cst : f32 to vector<32x128xf32>
    %14 = arith.subf %13, %12 : vector<32x128xf32>
    %15 = math.exp %14 : vector<32x128xf32>
    %cst_7 = arith.constant 1.000000e+00 : f32
    %16 = vector.broadcast %cst_7 : f32 to vector<32x128xf32>
    %17 = arith.addf %16, %15 : vector<32x128xf32>
    %18 = tpu.reciprocal %17 {approx = true} : vector<32x128xf32> -> vector<32x128xf32>
    %cst_8 = arith.constant 1.000000e+00 : f32
    %19 = vector.broadcast %cst_8 : f32 to vector<32x128xf32>
    %20 = arith.subf %19, %18 : vector<32x128xf32>
    %c2_i32 = arith.constant 2 : i32
    %21 = vector.broadcast %c2_i32 : i32 to vector<32x128xi32>
    %22 = arith.cmpi slt, %7, %21 : vector<32x128xi32>
    %cst_9 = arith.constant 0.000000e+00 : f32
    %23 = vector.broadcast %cst_9 : f32 to vector<32x128xf32>
    %24 = arith.select %22, %20, %23 : vector<32x128xi1>, vector<32x128xf32>
    %c0_i32_10 = arith.constant 0 : i32
    %25 = vector.broadcast %c0_i32_10 : i32 to vector<32x128xi32>
    %26 = arith.cmpi eq, %7, %25 : vector<32x128xi32>
    %cst_11 = arith.constant 0.000000e+00 : f32
    %27 = vector.broadcast %cst_11 : f32 to vector<32x128xf32>
    %28 = arith.select %26, %24, %27 : vector<32x128xi1>, vector<32x128xf32>
    %cst_12 = arith.constant 1.000000e+00 : f32
    %29 = vector.broadcast %cst_12 : f32 to vector<32x128xf32>
    %30 = arith.addf %24, %29 : vector<32x128xf32>
    %31 = arith.select %26, %30, %24 : vector<32x128xi1>, vector<32x128xf32>
    %32 = vector.shape_cast %28 : vector<32x128xf32> to vector<4x8x128xf32>
    %cst_13 = arith.constant dense<0.000000e+00> : vector<8x128xf32>
    %33 = vector.multi_reduction <add>, %32, %cst_13 [0] : vector<4x8x128xf32> to vector<8x128xf32>
    %34 = vector.shape_cast %31 : vector<32x128xf32> to vector<4x8x128xf32>
    %cst_14 = arith.constant dense<0.000000e+00> : vector<8x128xf32>
    %35 = vector.multi_reduction <add>, %34, %cst_14 [0] : vector<4x8x128xf32> to vector<8x128xf32>
    %cst_15 = arith.constant 0.000000e+00 : f32
    %36 = vector.broadcast %cst_15 : f32 to vector<32x128xf32>
    %37 = arith.select %22, %18, %36 : vector<32x128xi1>, vector<32x128xf32>
    %c1_i32 = arith.constant 1 : i32
    %38 = vector.broadcast %c1_i32 : i32 to vector<32x128xi32>
    %39 = arith.cmpi eq, %7, %38 : vector<32x128xi32>
    %cst_16 = arith.constant 0.000000e+00 : f32
    %40 = vector.broadcast %cst_16 : f32 to vector<32x128xf32>
    %41 = arith.select %39, %37, %40 : vector<32x128xi1>, vector<32x128xf32>
    %cst_17 = arith.constant 1.000000e+00 : f32
    %42 = vector.broadcast %cst_17 : f32 to vector<32x128xf32>
    %43 = arith.addf %37, %42 : vector<32x128xf32>
    %44 = arith.select %39, %43, %37 : vector<32x128xi1>, vector<32x128xf32>
    %45 = vector.shape_cast %41 : vector<32x128xf32> to vector<4x8x128xf32>
    %cst_18 = arith.constant dense<0.000000e+00> : vector<8x128xf32>
    %46 = vector.multi_reduction <add>, %45, %cst_18 [0] : vector<4x8x128xf32> to vector<8x128xf32>
    %47 = vector.shape_cast %44 : vector<32x128xf32> to vector<4x8x128xf32>
    %cst_19 = arith.constant dense<0.000000e+00> : vector<8x128xf32>
    %48 = vector.multi_reduction <add>, %47, %cst_19 [0] : vector<4x8x128xf32> to vector<8x128xf32>
    %c0_20 = arith.constant 0 : index
    %c0_21 = arith.constant 0 : index
    %c0_22 = arith.constant 0 : index
    %c0_23 = arith.constant 0 : index
    %49 = vector.load %arg5[%c0_20, %c0_21, %c0_22, %c0_23] : memref<1x2x8x128xf32, #tpu.memory_space<vmem>>, vector<1x2x8x128xf32>
    %50 = vector.shape_cast %33 : vector<8x128xf32> to vector<1x8x128xf32>
    %51 = vector.shape_cast %46 : vector<8x128xf32> to vector<1x8x128xf32>
    %52 = tpu.concatenate %50, %51 in 0 : vector<1x8x128xf32>, vector<1x8x128xf32> -> vector<2x8x128xf32>
    %53 = vector.shape_cast %52 : vector<2x8x128xf32> to vector<1x2x8x128xf32>
    %54 = arith.addf %49, %53 : vector<1x2x8x128xf32>
    %c0_24 = arith.constant 0 : index
    %c0_25 = arith.constant 0 : index
    %c0_26 = arith.constant 0 : index
    %c0_27 = arith.constant 0 : index
    %55 = vector.load %arg5[%c0_24, %c0_25, %c0_26, %c0_27] : memref<1x2x8x128xf32, #tpu.memory_space<vmem>>, vector<1x2x8x128xf32>
    tpu.vector_store %arg5[%c0_24, %c0_25, %c0_26, %c0_27], %54 {strides = array<i32>} : memref<1x2x8x128xf32, #tpu.memory_space<vmem>>, vector<1x2x8x128xf32>,
    %c0_28 = arith.constant 0 : index
    %c0_29 = arith.constant 0 : index
    %c0_30 = arith.constant 0 : index
    %c0_31 = arith.constant 0 : index
    %56 = vector.load %arg6[%c0_28, %c0_29, %c0_30, %c0_31] : memref<1x2x8x128xf32, #tpu.memory_space<vmem>>, vector<1x2x8x128xf32>
    %57 = vector.shape_cast %35 : vector<8x128xf32> to vector<1x8x128xf32>
    %58 = vector.shape_cast %48 : vector<8x128xf32> to vector<1x8x128xf32>
    %59 = tpu.concatenate %57, %58 in 0 : vector<1x8x128xf32>, vector<1x8x128xf32> -> vector<2x8x128xf32>
    %60 = vector.shape_cast %59 : vector<2x8x128xf32> to vector<1x2x8x128xf32>
    %61 = arith.addf %56, %60 : vector<1x2x8x128xf32>
    %c0_32 = arith.constant 0 : index
    %c0_33 = arith.constant 0 : index
    %c0_34 = arith.constant 0 : index
    %c0_35 = arith.constant 0 : index
    %62 = vector.load %arg6[%c0_32, %c0_33, %c0_34, %c0_35] : memref<1x2x8x128xf32, #tpu.memory_space<vmem>>, vector<1x2x8x128xf32>
    tpu.vector_store %arg6[%c0_32, %c0_33, %c0_34, %c0_35], %61 {strides = array<i32>} : memref<1x2x8x128xf32, #tpu.memory_space<vmem>>, vector<1x2x8x128xf32>,
    return
  }
  func.func @transform_0(%arg0: i32, %arg1: i32, %arg2: i32) -> (i32, i32, i32, i32) {
    %c1_i32 = arith.constant 1 : i32
    %0 = arith.muli %arg1, %c1_i32 : i32
    %1 = arith.addi %0, %arg2 : i32
    %c0_i32 = arith.constant 0 : i32
    %c0_i32_0 = arith.constant 0 : i32
    %c0_i32_1 = arith.constant 0 : i32
    return %arg0, %c0_i32, %1, %c0_i32_0 : i32, i32, i32, i32
  }
  func.func @transform_1(%arg0: i32, %arg1: i32, %arg2: i32) -> (i32, i32, i32) {
    %c1_i32 = arith.constant 1 : i32
    %0 = arith.muli %arg1, %c1_i32 : i32
    %1 = arith.addi %0, %arg2 : i32
    %c0_i32 = arith.constant 0 : i32
    %c0_i32_0 = arith.constant 0 : i32
    return %arg0, %1, %c0_i32 : i32, i32, i32
  }
  func.func @transform_2(%arg0: i32, %arg1: i32, %arg2: i32) -> (i32, i32, i32, i32) {
    %c1_i32 = arith.constant 1 : i32
    %0 = arith.muli %arg0, %c1_i32 : i32
    %1 = arith.addi %0, %arg1 : i32
    %c0_i32 = arith.constant 0 : i32
    %c0_i32_0 = arith.constant 0 : i32
    %c0_i32_1 = arith.constant 0 : i32
    %c0_i32_2 = arith.constant 0 : i32
    return %1, %c0_i32, %c0_i32_0, %c0_i32_1 : i32, i32, i32, i32
  }
  func.func @transform_3(%arg0: i32, %arg1: i32, %arg2: i32) -> (i32, i32, i32, i32) {
    %c1_i32 = arith.constant 1 : i32
    %0 = arith.muli %arg0, %c1_i32 : i32
    %1 = arith.addi %0, %arg1 : i32
    %c0_i32 = arith.constant 0 : i32
    %c0_i32_0 = arith.constant 0 : i32
    %c0_i32_1 = arith.constant 0 : i32
    %c0_i32_2 = arith.constant 0 : i32
    return %1, %c0_i32, %c0_i32_0, %c0_i32_1 : i32, i32, i32, i32
  }
}

</mosaic_0001>

<bundles_post_ra>
// kernel: tpu_custom_call.1
= control target key start
LH: loop header
LB: loop body
LE: loop exit
PB: predicated region body
PF: predicated region fallthrough
CT: control target
= control target key end

     0   :  { %9 = vsyncpa [#allocation3], 0  ;;  %s1246_s0 = inlined_call_operand.hbm [shape: f32[2,2,32,128], index: 0, kind: input, shape index: {}]   ;;  %s1247_s1 = inlined_call_operand.hbm [shape: s8[2,32,128], index: 1, kind: input, shape index: {}]   ;;  %s1248_s2 = inlined_call_operand.hbm [shape: f32[2,2,8,128], index: 2, kind: output, shape index: {0}]   ;;  %s1249_s3 = inlined_call_operand.hbm [shape: f32[2,2,8,128], index: 3, kind: output, shape index: {1}]  }
   0x1   :  { %11 = vsyncpa [#allocation3 + $0x1], 0 }
   0x2   :  { %12 = vsyncpa [#allocation6], 0 }
   0x3   :  { %14 = vsyncpa [#allocation6 + $0x1], 0 }
   0x4   :  { %15 = vsyncpa [#allocation4], 0 }
   0x5   :  { %17 = vsyncpa [#allocation4 + $0x1], 0 }
   0x6   :  { %18 = vsyncpa [#allocation9], 0 }
   0x7   :  { %20 = vsyncpa [#allocation9 + $0x1], 0  ;;  %s905_s12 = smov 0   ;;  %s907_s13 = smov 0  }
   0x8   :  { %s909_s14 = smov 0   ;;  %s911_s15 = smov 0  }
   0x9   :  { %s913_s16 = smov 0   ;;  %s915_s17 = smov 0  }
   0xa LB: > { %s579_s18 = sadd.s32 4294967295, %s875_s17   ;;  %s580_s19 = sadd.s32 4294967294, %s875_s17   ;;  %s875_s17 = sphi %s915_s17, %s26_s17   ;;  %s871_s16 = sphi %s913_s16, %s1268_s16   ;;  %s867_s15 = sphi %s911_s15, %s1267_s15   ;;  %s863_s14 = sphi %s909_s14, %s1266_s14   ;;  %s859_s13 = sphi %s907_s13, %s1265_s13   ;;  %s855_s12 = sphi %s905_s12, %s1264_s12  }
   0xb   : > { %s45_s20 = sadd.s32 1, %s871_s16  ;;  %s56_s21 = sadd.s32 1, %s863_s14 }
   0xc   : > { %p47_p0 = scmp.ge.s32.totalorder %s45_s20, 2  ;;  %p63_p1 = scmp.ne.s32.totalorder %s863_s14, %s859_s13 }
   0xd   : > { %p64_p2 = scmp.eq.s32.totalorder %s875_s17, 0  ;;  %p69_p3 = scmp.ne.s32.totalorder %s859_s13, %s855_s12 }
   0xe   : > { %s1270_s20 = smov (%p47_p0, %s45_s20), 0  ;;  %p70_p5 = scmp.eq.s32.totalorder %s579_s18, 0 }
   0xf   : > { %p946_p4 = por %p64_p2, %p63_p1  ;;  %s51_s23 = ssub.s32 %s871_s16, %s1270_s20 }
  0x10   : > { %p125_p6 = scmp.eq.s32.totalorder %s579_s18, 1  ;;  %p54_p7 = scmp.eq.s32.totalorder %s51_s23, 0 }
  0x11   : > { %p952_p8 = por %p70_p5, %p69_p3  ;;  %p131_p10 = scmp.eq.s32.totalorder %s580_s19, 1 }
  0x12   : > { %p956_p9 = por %p125_p6, %p63_p1  ;;  %p626_p13 = scmp.lt.s32.totalorder %s875_s17, 2 }
  0x13   : > { %s1253_s24 = scalar_select %p952_p8, 1, 0 }
  0x14   : > { %s1254_s25 = scalar_select %p956_p9, 1, 0 }
  0x15   : > { %s961_s26 = scalar_select %p54_p7, %s863_s14, %s56_s21  }
  0x16   : > { %p963_p11 = por %p131_p10, %p69_p3  ;;  %s970_s28 = sand.u32 1, %s863_s14  }
  0x17   : > { %s583_s29 = sshll.u32 %s970_s28, 6  ;;  %s601_s30 = sshll.u32 %s871_s16, 10 }
  0x18   : > { %s1255_s27 = scalar_select %p963_p11, 1, 0 }
  0x19   : > { %s977_s6 = scalar_lea.hbm %s1246_s0, %s601_s30  ;;  %s183_s7 = scalar_lea.vmem [#allocation2], %s583_s29 }
  0x1a   : > { %s193_s8 = sshll.u32 %s183_s7, 4  ;;  %p983_p0 = pnand %p626_p13, %p946_p4  ;;  %s979_s8 = int_to_ptr.vmem [resolvable:$true] %s193_s8 }
  0x1b   : > { %s180_s10 = scalar_lea.sflag [#allocation3], %s970_s28  ;;  %s697_s11 = scalar_lea.hbm %s977_s6, 1024 }
  0x1c   : > { %p698_p2 = scmp.ne.s32.totalorder %s977_s6, %s697_s11  ;;  %p699_p3 = pneg %p983_p0 }
  0x1d   : > { %s702_s21 = scalar_lea.hbm %s1246_s0, 2048  ;;  %p703_p4 = scmp.lt.u32.totalorder %s977_s6, %s1246_s0 }
  0x1e   : > { %p700_p5 = pnand %p699_p3, %p698_p2  ;;  %p704_p7 = scmp.lt.u32.totalorder %s702_s21, %s697_s11 }
  0x1f   : > { %p706_p13 = scmp.lt.u32.totalorder %s697_s11, %s977_s6 }
  0x20   : > { %p701_p6 = pneg %p700_p5  ;;  %p705_p10 = por %p704_p7, %p703_p4 }
  0x22   : > { %p707_p12 = por %p706_p13, %p705_p10 }
  0x24   : > { %p708_p1 = pnand %p707_p12, %p701_p6 }
  0x26   : > { %711 = shalt.err (!%p708_p1)
}
  0x27   : > { %s712_s29 = scalar_lea.vmem %s979_s8, 1024  ;;  %s877_s30 = smov [#allocation2]  }
  0x28   : > { %p713_p2 = scmp.ne.s32.totalorder %s979_s8, %s712_s29  ;;  %s717_s4 = sshll.u32 %s877_s30, 4  ;;  %s718_s4 = int_to_ptr.vmem [resolvable:$false] %s717_s4 }
  0x29   : > { %s719_s5 = scalar_lea.vmem %s718_s4, 2048  ;;  %p720_p9 = scmp.lt.s32.totalorder %s979_s8, %s718_s4 }
  0x2a   : > { %p715_p5 = pnand %p713_p2, %p699_p3  ;;  %p721_p4 = scmp.lt.s32.totalorder %s719_s5, %s712_s29 }
  0x2c   : > { %p716_p11 = pneg %p715_p5  ;;  %p722_p7 = por %p721_p4, %p720_p9 }
  0x2e   : > { %p723_p10 = pnand %p722_p7, %p716_p11 }
  0x30   : > { %726 = shalt.err (!%p723_p10)
}
  0x31   : > { %s878_s7 = smov 128   ;;  %s879_s11 = smov 8  }
  0x32   : > { %615 = dma.hbm_to_vmem [thread:$0]  (!%p983_p0), %s977_s6, 1024, %s979_s8, %s180_s10, %s878_s7, %s878_s7, %s879_s11  }
  0x33   : > { %p221_p12 = scmp.lt.s32.totalorder %s875_s17, 3  ;;  %s586_s18 = sshll.u32 %s970_s28, 3 }
  0x34   : > { %s587_s19 = sshll.u32 %s871_s16, 7  ;;  %p1257_p9 = scmp.ge.s32.totalorder %s875_s17, 1 }
  0x35   : > { %s1028_s29 = scalar_lea.hbm %s1247_s1, %s587_s19  ;;  %s207_s30 = scalar_lea.vmem [#allocation5], %s586_s18 }
  0x36   : > { %p1021_p11 = pnand %p1257_p9, %p221_p12  ;;  %s216_s4 = sshll.u32 %s207_s30, 4  ;;  %s217_s4 = int_to_ptr.vmem [resolvable:$true] %s216_s4 }
  0x37   : > { %s204_s6 = scalar_lea.sflag [#allocation6], %s970_s28  ;;  %s727_s8 = scalar_lea.hbm %s1028_s29, 128 }
  0x38   : > { %s1258_s21 = scalar_select %p1021_p11, 1, 0 }
  0x39   : > { %p728_p1 = scmp.ne.s32.totalorder %s1028_s29, %s727_s8  ;;  %s732_s7 = scalar_lea.hbm %s1247_s1, 256 }
  0x3a   : > { %p733_p2 = scmp.lt.u32.totalorder %s1028_s29, %s1247_s1  ;;  %p734_p5 = scmp.lt.u32.totalorder %s732_s7, %s727_s8 }
  0x3b   : > { %p730_p6 = pnand %p728_p1, %p699_p3  ;;  %p736_p7 = scmp.lt.u32.totalorder %s727_s8, %s1028_s29 }
  0x3c   : > { %p735_p4 = por %p734_p5, %p733_p2 }
  0x3d   : > { %p731_p13 = pneg %p730_p6 }
  0x3e   : > { %p737_p10 = por %p736_p7, %p735_p4 }
  0x40   : > { %p738_p12 = pnand %p737_p10, %p731_p13 }
  0x42   : > { %741 = shalt.err (!%p738_p12)
}
  0x43   : > { %s742_s28 = scalar_lea.vmem %s217_s4, 128  ;;  %s880_s18 = smov [#allocation5]  }
  0x44   : > { %p743_p9 = scmp.ne.s32.totalorder %s217_s4, %s742_s28  ;;  %s747_s22 = sshll.u32 %s880_s18, 4  ;;  %s748_s22 = int_to_ptr.vmem [resolvable:$false] %s747_s22 }
  0x45   : > { %s749_s23 = scalar_lea.vmem %s748_s22, 256  ;;  %p750_p8 = scmp.lt.s32.totalorder %s217_s4, %s748_s22 }
  0x46   : > { %p745_p1 = pnand %p743_p9, %p699_p3  ;;  %p751_p11 = scmp.lt.s32.totalorder %s749_s23, %s742_s28 }
  0x48   : > { %p746_p6 = pneg %p745_p1  ;;  %p752_p2 = por %p751_p11, %p750_p8 }
  0x4a   : > { %p753_p5 = pnand %p752_p2, %p746_p6 }
  0x4c   : > { %756 = shalt.err (!%p753_p5)
}
  0x4d   : > { %618 = dma.hbm_to_vmem [thread:$0]  (!%p983_p0), %s1028_s29, 128, %s217_s4, %s204_s6  }
  0x4e   : > { %p1259_p13 = scmp.ne.s32.totalorder %s1258_s21, 0 }
  0x4f   : > { %s1053_s30 = sand.u32 (!%p1259_p13), 1, %s859_s13   ;;  %p1260_p3 = scmp.ne.s32.totalorder (!%p1259_p13), %s1253_s24, 0 }
  0x50   : > { %225 = sbr.rel (%p1259_p13) target bundleno = 174 (0xae), region = 28  ;;  %s589_s8 = sshll.u32 (!%p1259_p13), %s1053_s30, 6 }
  0x51   : > { %s228_s10 = scalar_lea.sflag (!%p1259_p13), [#allocation3], %s1053_s30  ;;  %s231_s5 = scalar_lea.vmem (!%p1259_p13), [#allocation2], %s589_s8 }
  0x57   : > { %838 = dma.done.wait (%p1260_p3), %s228_s10, 1024  }
  0x58   : > { %840 = vsyncadd (%p1260_p3), %s228_s10, 4294966272  ;;  %s590_s9 = sshll.u32 %s1053_s30, 3  ;;  %s237_s21 = scalar_lea.sflag [#allocation6], %s1053_s30 }
  0x59   : > { %s1063_s29 = scalar_lea.vmem [#allocation5], %s590_s9 }
  0x5a   : > { %842 = dma.done.wait (%p1260_p3), %s237_s21, 128  }
  0x5b   : > { %844 = vsyncadd (%p1260_p3), %s237_s21, 4294967168  ;;  %v286_v0 = vld [vmem:[%s231_s5] sm:$0xff]  ;;  %v287_v1 = vld [vmem:[%s231_s5 + $0x8] sm:$0xff]  ;;  %s591_s24 = sshll.u32 %s1053_s30, 4  ;;  %s602_s4 = sshll.u32 %s867_s15, 8 }
  0x5c   : > { %v288_v2 = vld [vmem:[%s231_s5 + $0x10] sm:$0xff]  ;;  %v289_v3 = vld [vmem:[%s231_s5 + $0x18] sm:$0xff]  ;;  %v290_v4 = vld [vmem:[%s231_s5 + $0x20] sm:$0xff]  ;;  %s265_s6 = scalar_lea.vmem [#allocation7], %s591_s24  ;;  %s1145_s28 = scalar_lea.hbm %s1248_s2, %s602_s4 }
  0x5d   : > { %v291_v5 = vld [vmem:[%s231_s5 + $0x28] sm:$0xff]  ;;  %v292_v6 = vld [vmem:[%s231_s5 + $0x30] sm:$0xff]  ;;  %v293_v7 = vld [vmem:[%s231_s5 + $0x38] sm:$0xff]  ;;  %v299_v8 = vsub.f32 %v290_v4, %v286_v0  ;;  %s415_s7 = sshll.u32 %s265_s6, 4  ;;  %s1153_s18 = scalar_lea.vmem [#allocation8], %s591_s24  ;;  %s1147_s7 = int_to_ptr.vmem [resolvable:$true] %s415_s7 }
  0x5e   : > { %v300_v9 = vsub.f32 %v291_v5, %v287_v1  ;;  %v301_v10 = vsub.f32 %v292_v6, %v288_v2  ;;  %v302_v11 = vsub.f32 %v293_v7, %v289_v3  ;;  %v294_v27 = vld [vmem:[%s1063_s29] sm:$0xff]  ;;  %s432_s22 = sshll.u32 %s1153_s18, 4  ;;  %s396_s23 = scalar_lea.sflag [#allocation4], %s1053_s30  ;;  %s1193_s22 = int_to_ptr.vmem [resolvable:$true] %s432_s22 }
  0x5f   : > { %v303_v12 = vsub.f32 0.0, %v299_v8  ;;  %v1070_v29 = vunpack.c.0.s8 %v294_v27  ;;  %v1072_v30 = vunpack.c.1.s8 %v294_v27  ;;  %v1074_v31 = vunpack.c.2.s8 %v294_v27  ;;  %s757_s8 = scalar_lea.vmem %s1147_s7, 256  ;;  %p1261_p0 = scmp.ne.s32.totalorder %s1254_s25, 0 }
  0x60   : > { %v304_v13 = vsub.f32 0.0, %v300_v9  ;;  %v305_v14 = vsub.f32 0.0, %v301_v10  ;;  %v306_v15 = vsub.f32 0.0, %v302_v11  ;;  %v1076_v32 = vunpack.c.3.s8 %v294_v27  ;;  %p758_p8 = scmp.ne.s32.totalorder %s1147_s7, %s757_s8  ;;  %s881_s10 = smov [#allocation7]  }
  0x61   : > { %v307_v16 = vmul.f32 1.442695, %v303_v12  ;;  %vm327_vm0 = vcmp.lt.s32.totalorder %v1070_v29, 2  ;;  %vm328_vm1 = vcmp.lt.s32.totalorder %v1072_v30, 2  ;;  %vm329_vm2 = vcmp.lt.s32.totalorder %v1074_v31, 2  ;;  %s761_s5 = sshll.u32 %s881_s10, 4  ;;  %s762_s5 = int_to_ptr.vmem [resolvable:$false] %s761_s5 }
  0x62   : > { %v309_v17 = vmul.f32 1.442695, %v304_v13  ;;  %v311_v18 = vmul.f32 1.442695, %v305_v14  ;;  %v313_v19 = vmul.f32 1.442695, %v306_v15  ;;  %p759_p11 = pnand %p758_p8, %p1261_p0  ;;  %p764_p7 = scmp.lt.s32.totalorder %s1147_s7, %s762_s5 }
  0x63   : > { %681 = vpow2.f32 %v307_v16  ;;  %vm330_vm3 = vcmp.lt.s32.totalorder %v1076_v32, 2  ;;  %vm335_vm4 = vcmp.eq.s32.totalorder %v1070_v29, 0  ;;  %vm361_vm5 = vcmp.eq.s32.totalorder %v1070_v29, 1  ;;  %s763_s9 = scalar_lea.vmem %s762_s5, 512 }
  0x64   : > { %683 = vpow2.f32 %v309_v17  ;;  %vm336_vm6 = vcmp.eq.s32.totalorder %v1072_v30, 0  ;;  %vm337_vm7 = vcmp.eq.s32.totalorder %v1074_v31, 0  ;;  %vm338_vm8 = vcmp.eq.s32.totalorder %v1076_v32, 0  ;;  %p760_p4 = pneg %p759_p11  ;;  %p765_p10 = scmp.lt.s32.totalorder %s763_s9, %s757_s8 }
  0x65   : > { %685 = vpow2.f32 %v311_v18  ;;  %vm362_vm9 = vcmp.eq.s32.totalorder %v1072_v30, 1  ;;  %vm363_vm10 = vcmp.eq.s32.totalorder %v1074_v31, 1  ;;  %vm364_vm11 = vcmp.eq.s32.totalorder %v1076_v32, 1 }
  0x66   : > { %687 = vpow2.f32 %v313_v19  ;;  %p766_p12 = por %p765_p10, %p764_p7 }
  0x68   : > { %p767_p9 = pnand %p766_p12, %p760_p4 }
  0x6d   : > { %v682_v20 = vpop.eup %681 }
  0x6e   : > { %v684_v21 = vpop.eup %683  ;;  %v315_v22 = vadd.f32 1.0, %v682_v20 }
  0x6f   : > { %v686_v23 = vpop.eup %685  ;;  %v316_v24 = vadd.f32 1.0, %v684_v21 }
  0x70   : > { %v688_v25 = vpop.eup %687  ;;  %v317_v26 = vadd.f32 1.0, %v686_v23  ;;  %689 = vrcp.f32 %v315_v22 }
  0x71   : > { %v318_v28 = vadd.f32 1.0, %v688_v25  ;;  %691 = vrcp.f32 %v316_v24 }
  0x72   : > { %693 = vrcp.f32 %v317_v26 }
  0x73   : > { %695 = vrcp.f32 %v318_v28 }
  0x7a   : > { %v690_v33 = vpop.eup %689 }
  0x7b   : > { %v692_v34 = vpop.eup %691  ;;  %v323_v35 = vsub.f32 1.0, %v690_v33  ;;  %v357_v36 = vsel %vm327_vm0, %v690_v33, 0.0 }
  0x7c   : > { %v694_v37 = vpop.eup %693  ;;  %v324_v38 = vsub.f32 1.0, %v692_v34  ;;  %v358_v39 = vsel %vm328_vm1, %v692_v34, 0.0  ;;  %v365_v40 = vsel %vm361_vm5, %v357_v36, 0.0  ;;  %v369_v41 = vadd.f32 1.0, %v357_v36 }
  0x7d   : > { %v696_v42 = vpop.eup %695  ;;  %v325_v43 = vsub.f32 1.0, %v694_v37  ;;  %v331_v44 = vsel %vm327_vm0, %v323_v35, 0.0  ;;  %v359_v45 = vsel %vm329_vm2, %v694_v37, 0.0  ;;  %v366_v46 = vsel %vm362_vm9, %v358_v39, 0.0 }
  0x7e   : > { %v326_v47 = vsub.f32 1.0, %v696_v42  ;;  %v332_v48 = vsel %vm328_vm1, %v324_v38, 0.0  ;;  %v339_v49 = vsel %vm335_vm4, %v331_v44, 0.0  ;;  %v360_v50 = vsel %vm330_vm3, %v696_v42, 0.0 }
  0x7f   : > { %v333_v51 = vsel %vm329_vm2, %v325_v43, 0.0  ;;  %v340_v52 = vsel %vm336_vm6, %v332_v48, 0.0  ;;  %v367_v53 = vsel %vm363_vm10, %v359_v45, 0.0  ;;  %v368_v54 = vsel %vm364_vm11, %v360_v50, 0.0 }
  0x80   : > { %v334_v55 = vsel %vm330_vm3, %v326_v47, 0.0  ;;  %v341_v56 = vsel %vm337_vm7, %v333_v51, 0.0  ;;  %v351_v57 = vadd.f32 %v340_v52, %v339_v49  ;;  %v377_v58 = vadd.f32 %v366_v46, %v365_v40 }
  0x81   : > { %v342_v59 = vsel %vm338_vm8, %v334_v55, 0.0  ;;  %v343_v60 = vadd.f32 1.0, %v331_v44  ;;  %v344_v61 = vadd.f32 1.0, %v332_v48  ;;  %v345_v62 = vadd.f32 1.0, %v333_v51 }
  0x82   : > { %v352_v63 = vadd.f32 %v351_v57, %v341_v56  ;;  %v378_v0 = vadd.f32 %v377_v58, %v367_v53  ;;  %v346_v1 = vadd.f32 1.0, %v334_v55  ;;  %v370_v2 = vadd.f32 1.0, %v358_v39 }
  0x83   : > { %v347_v3 = vsel %vm335_vm4, %v343_v60, %v331_v44  ;;  %v348_v4 = vsel %vm336_vm6, %v344_v61, %v332_v48  ;;  %v349_v5 = vsel %vm337_vm7, %v345_v62, %v333_v51  ;;  %v371_v6 = vadd.f32 1.0, %v359_v45 }
  0x84   : > { %v353_v7 = vadd.f32 %v352_v63, %v342_v59  ;;  %v379_v8 = vadd.f32 %v378_v0, %v368_v54  ;;  %v350_v9 = vsel %vm338_vm8, %v346_v1, %v334_v55  ;;  %v354_v10 = vadd.f32 %v348_v4, %v347_v3 }
  0x85   : > { %v372_v11 = vadd.f32 1.0, %v360_v50  ;;  %v373_v12 = vsel %vm361_vm5, %v369_v41, %v357_v36  ;;  %v374_v13 = vsel %vm362_vm9, %v370_v2, %v358_v39  ;;  %v375_v14 = vsel %vm363_vm10, %v371_v6, %v359_v45 }
  0x86   : > { %v355_v15 = vadd.f32 %v354_v10, %v349_v5  ;;  %v380_v16 = vadd.f32 %v374_v13, %v373_v12  ;;  %387 = vst [vmem:[%s265_s6] sm:$0xff] %v353_v7  ;;  %388 = vst [vmem:[%s265_s6 + $0x8] sm:$0xff] %v379_v8 }
  0x87   : > { %v376_v17 = vsel %vm364_vm11, %v372_v11, %v360_v50 }
  0x88   : > { %v356_v18 = vadd.f32 %v355_v15, %v350_v9  ;;  %v381_v19 = vadd.f32 %v380_v16, %v375_v14 }
  0x89   : > { %770 = shalt.err (!%p767_p9)
}
  0x8a   : > { %s771_s21 = scalar_lea.hbm %s1145_s28, 256  ;;  %s775_s6 = scalar_lea.hbm %s1248_s2, 512 }
  0x8b   : > { %p772_p1 = scmp.ne.s32.totalorder %s1145_s28, %s771_s21  ;;  %p776_p5 = scmp.lt.u32.totalorder %s1145_s28, %s1248_s2 }
  0x8c   : > { %p777_p13 = scmp.lt.u32.totalorder %s775_s6, %s771_s21  ;;  %p779_p8 = scmp.lt.u32.totalorder %s771_s21, %s1145_s28 }
  0x8d   : > { %p773_p6 = pnand %p772_p1, %p1261_p0 }
  0x8e   : > { %p778_p3 = por %p777_p13, %p776_p5 }
  0x8f   : > { %p774_p2 = pneg %p773_p6 }
  0x90   : > { %p780_p11 = por %p779_p8, %p778_p3 }
  0x92   : > { %p781_p4 = pnand %p780_p11, %p774_p2 }
  0x94   : > { %784 = shalt.err (!%p781_p4)
}
  0x95   : > { %s882_s8 = smov 128   ;;  %s883_s10 = smov 8   ;;  %v382_v20 = vadd.f32 %v381_v19, %v376_v17  ;;  %393 = vst [vmem:[%s1153_s18] sm:$0xff] %v356_v18 }
  0x96   : > { %608 = dma.vmem_to_hbm [thread:$0]  (%p1261_p0), %s1147_s7, 256, %s1145_s28, %s396_s23, %s882_s8, %s882_s8, %s883_s10  }
  0x97   : > { %s1189_s21 = scalar_lea.hbm %s1249_s3, %s602_s4  ;;  %394 = vst [vmem:[%s1153_s18 + $0x8] sm:$0xff] %v382_v20  ;;  %s401_s29 = scalar_lea.sflag [#allocation9], %s1053_s30 }
  0x98   : > { %s785_s24 = scalar_lea.vmem %s1193_s22, 256  ;;  %s884_s7 = smov [#allocation8]  }
  0x99   : > { %p786_p7 = scmp.ne.s32.totalorder %s1193_s22, %s785_s24  ;;  %s789_s15 = sshll.u32 %s884_s7, 4  ;;  %s790_s15 = int_to_ptr.vmem [resolvable:$false] %s789_s15 }
  0x9a   : > { %s791_s28 = scalar_lea.vmem %s790_s15, 512  ;;  %p792_p9 = scmp.lt.s32.totalorder %s1193_s22, %s790_s15 }
  0x9b   : > { %p787_p10 = pnand %p786_p7, %p1261_p0  ;;  %p793_p1 = scmp.lt.s32.totalorder %s791_s28, %s785_s24 }
  0x9d   : > { %p788_p12 = pneg %p787_p10  ;;  %p794_p6 = por %p793_p1, %p792_p9 }
  0x9f   : > { %p795_p2 = pnand %p794_p6, %p788_p12 }
  0xa1   : > { %798 = shalt.err (!%p795_p2)
}
  0xa2   : > { %s799_s4 = scalar_lea.hbm %s1189_s21, 256  ;;  %s803_s6 = scalar_lea.hbm %s1249_s3, 512 }
  0xa3   : > { %p800_p5 = scmp.ne.s32.totalorder %s1189_s21, %s799_s4  ;;  %p804_p8 = scmp.lt.u32.totalorder %s1189_s21, %s1249_s3 }
  0xa4   : > { %p805_p11 = scmp.lt.u32.totalorder %s803_s6, %s799_s4  ;;  %p807_p7 = scmp.lt.u32.totalorder %s799_s4, %s1189_s21 }
  0xa5   : > { %p801_p13 = pnand %p800_p5, %p1261_p0 }
  0xa6   : > { %p806_p4 = por %p805_p11, %p804_p8 }
  0xa7   : > { %p802_p3 = pneg %p801_p13 }
  0xa8   : > { %p808_p10 = por %p807_p7, %p806_p4 }
  0xaa   : > { %p809_p12 = pnand %p808_p10, %p802_p3 }
  0xac   : > { %812 = shalt.err (!%p809_p12)
}
  0xad   : > { %609 = dma.vmem_to_hbm [thread:$0]  (%p1261_p0), %s1193_s22, 256, %s1189_s21, %s401_s29, %s882_s8, %s882_s8, %s883_s10  }
  0xae PF: > { %s447_s5 = sand.u32 1, %s855_s12   ;;  %p1262_p9 = scmp.ne.s32.totalorder %s1255_s27, 0 }
  0xaf   : > { %p1263_p1 = scmp.ge.s32.totalorder %s875_s17, 2  ;;  %s448_s9 = scalar_lea.sflag [#allocation4], %s447_s5 }
  0xb1   : > { %p620_p6 = pnand %p1263_p1, %p1262_p9 }
  0xb3   : > { %846 = dma.done.wait (!%p620_p6), %s448_s9, 256  }
  0xb4   : > { %848 = vsyncadd (!%p620_p6), %s448_s9, 4294967040  ;;  %s457_s25 = scalar_lea.sflag [#allocation9], %s447_s5 }
  0xb5   : > { %850 = dma.done.wait (!%p620_p6), %s457_s25, 256  }
  0xb6   : > { %852 = vsyncadd (!%p620_p6), %s457_s25, 4294967040  ;;  %s26_s17 = sadd.s32 1, %s875_s17   ;;  %s1264_s12 = smov %s859_s13 }
  0xb7   : > { %p23_p2 = scmp.ge.s32.totalorder %s26_s17, 4   ;;  %s1265_s13 = smov %s863_s14 }
  0xb8   : > { %s1266_s14 = smov %s961_s26  ;;  %s1267_s15 = smov %s871_s16 }
  0xb9   : > { %s1268_s16 = smov %s1270_s20  ;;  %25 = sbr.rel (!%p23_p2) target bundleno = 10 (0xa), region = 107 }
  0xc0   :  { %462 = vsyncpa [#allocation3], 1 }
  0xc1   :  { %464 = vsyncpa [#allocation3 + $0x1], 1 }
  0xc2   :  { %465 = vsyncpa [#allocation6], 1 }
  0xc3   :  { %467 = vsyncpa [#allocation6 + $0x1], 1 }
  0xc4   :  { %468 = vsyncpa [#allocation4], 1 }
  0xc5   :  { %470 = vsyncpa [#allocation4 + $0x1], 1 }
  0xc6   :  { %471 = vsyncpa [#allocation9], 1 }
  0xc7   :  { %473 = vsyncpa [#allocation9 + $0x1], 1 }

</bundles_post_ra>
